<compile_context>
chip_gen: v7x
topology: tpu7x:2x2x1
jax: 0.10.0
libtpu: 0.0.40
codegen_flags: <defaults>
</compile_context>

<pallas_src>
import numpy as np
import jax
import jax.numpy as jnp
from jax.experimental import pallas as pl
from jax.experimental.pallas import tpu as pltpu


def _bilinear_matrix(n_in: int, n_out: int) -> np.ndarray:
    """Row-interpolation matrix of nn.UpsamplingBilinear2d (align_corners=True)."""
    A = np.zeros((n_out, n_in), dtype=np.float32)
    for i in range(n_out):
        pos = 0.0 if n_out <= 1 else i * (n_in - 1) / (n_out - 1)
        i0 = int(np.floor(pos))
        i1 = min(i0 + 1, n_in - 1)
        w1 = pos - i0
        A[i, i0] += 1.0 - w1
        A[i, i1] += w1
    return A


def _make_kernel(use_norm: bool, eps: float, multi_tile: bool):
    def kernel(taps_ref, y_ref, w3k_ref, ah_ref, alpha_ref, gamma_ref, beta_ref,
               *rest):
        rest = list(rest)
        p1_ref = p2_ref = conv_ref = None
        if use_norm:
            p1_ref, p2_ref = rest[0], rest[1]
            rest = rest[2:]
        o_ref = rest[0]
        if multi_tile:
            conv_ref = rest[1]

        cd = w3k_ref.dtype

        # 3x3 conv with the 1x1-"up" half and the column bilinear upsample both
        # folded into the weights: one matmul with K = W*9*Cin, N = Wo*Cout.
        if multi_tile:
            @pl.when(pl.program_id(1) == 0)
            def _():
                conv_ref[...] = jnp.dot(
                    taps_ref[0], w3k_ref[...],
                    preferred_element_type=jnp.float32).astype(conv_ref.dtype)
            conv = conv_ref[...]                                      # (H, WoC)
        else:
            conv = jnp.dot(taps_ref[0], w3k_ref[...],
                           preferred_element_type=jnp.float32).astype(cd)

        # Row bilinear upsample (align_corners=True): (To, H) @ (H, WoC).
        up = jnp.dot(ah_ref[...], conv, preferred_element_type=jnp.float32)

        # cat([up, y]) + 1x1 conv: the y half was pre-mixed with w1b in the
        # wrapper, so only a lane-dense add remains.
        z = up + y_ref[0].astype(jnp.float32)                         # (To, WoC)

        # PReLU with a single shared alpha (SMEM scalar broadcast).
        alpha = alpha_ref[0]
        z = jnp.where(z >= 0.0, z, alpha * z)

        # Optional channels_first LayerNorm: per spatial position the Cout
        # channels are a contiguous lane group; separable projectors keep the
        # cost O(Wo*Cout*Wo) and everything lane-dense.  LN math stays in f32.
        if use_norm:
            u_s = jnp.dot(z.astype(cd), p1_ref[...],
                          preferred_element_type=jnp.float32)          # (To, Wo)
            u = jnp.dot(u_s.astype(cd), p2_ref[...],
                        preferred_element_type=jnp.float32)            # (To, WoC)
            d = z - u
            s_s = jnp.dot((d * d).astype(cd), p1_ref[...],
                          preferred_element_type=jnp.float32)
            s = jnp.dot(s_s.astype(cd), p2_ref[...],
                        preferred_element_type=jnp.float32)
            z = d * jax.lax.rsqrt(s + eps)
            z = z * gamma_ref[...] + beta_ref[...]

        o_ref[0] = z.astype(o_ref.dtype)

    return kernel


def _padded_block_bytes(block_shape, dtype):
    """Rough VMEM footprint of one block, padded to (8, 128) tiles."""
    shape = list(block_shape)
    shape[-1] = -(-shape[-1] // 128) * 128
    if len(shape) >= 2:
        shape[-2] = -(-shape[-2] // 8) * 8
    return int(np.prod(shape)) * jnp.dtype(dtype).itemsize


def _vmem_capacity_bytes() -> int:
    """Per-TensorCore VMEM capacity (128 MiB on v5e/v6e, 64 MiB on v7x)."""
    try:
        cap = getattr(pltpu.get_tpu_info(), "vmem_capacity_bytes", None)
        if cap:
            return int(cap)
    except Exception:
        pass
    return 64 * 2 ** 20   # conservative fallback (v7x per-core VMEM)


def norm_upsample(x_nchw, y_nchw, params, *, scale=2, use_norm=False, eps=1e-6,
                  compute_dtype=jnp.bfloat16, tile_ho=None, channels_last_out=False):
    """Pallas implementation of NormUpsample.forward(x, y).  NCHW in / NCHW out."""
    w3, w1a, w1b = params["w3"], params["w1a"], params["w1b"]
    alpha, gamma, beta = params["alpha"], params["gamma"], params["beta"]

    B, Cin, H, W = x_nchw.shape
    Cout = w3.shape[2]
    Ho, Wo = H * scale, W * scale
    assert y_nchw.shape == (B, Cout, Ho, Wo)

    cd = jnp.dtype(compute_dtype)
    out_dtype = x_nchw.dtype
    WK = W * 9 * Cin            # fused 3x3-conv contraction width per image row
    WoC = Wo * Cout             # lanes of an output image row (lane-dense store)

    # ---- device-aware VMEM budget & output-row tile selection --------------
    def vmem_estimate(tile, multi):
        blocks = [((1, H, WK), cd),                  # conv taps
                  ((1, tile, WoC), cd),              # pre-mixed y tile
                  ((WK, WoC), cd),                   # folded conv weights
                  ((tile if multi else Ho, H), cd),  # A_h rows
                  ((1, WoC), jnp.float32),           # LN gamma (lane-tiled)
                  ((1, WoC), jnp.float32),           # LN beta
                  ((1, tile, WoC), out_dtype)]       # output tile
        if use_norm:
            blocks += [((WoC, Wo), cd), ((Wo, WoC), cd)]
        est = 2 * sum(_padded_block_bytes(s, d) for s, d in blocks)  # double-buffered
        if multi:
            est += _padded_block_bytes((H, WoC), cd)                 # conv scratch
        return est

    vmem_cap = _vmem_capacity_bytes()
    budget = int(0.8 * vmem_cap)
    if tile_ho is None:
        tile_ho = Ho                                 # full-height tile, grid=(B,)
        if vmem_estimate(Ho, False) > budget:
            cands = [t for t in range(8, Ho, 8) if Ho % t == 0]
            tile_ho = cands[0] if cands else Ho
            for t in reversed(cands):
                if vmem_estimate(t, True) <= budget:
                    tile_ho = t
                    break
    assert Ho % tile_ho == 0 and (tile_ho % 8 == 0 or tile_ho == Ho)
    n_t = Ho // tile_ho
    multi_tile = n_t > 1
    vmem_limit = int(min(int(0.9 * vmem_cap),
                         max(32 * 2 ** 20, 2 * vmem_estimate(tile_ho, multi_tile))))

    # ---- glue (data movement only): layouts, zero-pad, 3x3 tap extraction ---
    x = jnp.transpose(x_nchw, (0, 2, 3, 1))                           # NHWC
    xp = jnp.pad(x, ((0, 0), (1, 1), (1, 1), (0, 0)))
    taps = jnp.stack(
        [xp[:, kh:kh + H, kw:kw + W, :] for kh in range(3) for kw in range(3)],
        axis=3).reshape(B, H, WK).astype(cd)                          # (B, H, WK)

    # y half of the 1x1 conv pre-mixed here (tiny Cout x Cout matmul that fuses
    # with the unavoidable NCHW->NHWC transpose) so the kernel only adds.
    y_mixed = jnp.einsum("bhwc,cd->bhwd",
                         jnp.transpose(y_nchw, (0, 2, 3, 1)).astype(jnp.float32),
                         w1b.astype(jnp.float32),
                         precision=jax.lax.Precision.HIGHEST)
    y_flat = y_mixed.reshape(B, Ho, WoC).astype(cd)

    # ---- weight preprocessing (pure parameter algebra, done once) -----------
    hi = jax.lax.Precision.HIGHEST
    # Fold the "up" half of the 1x1 conv AND the column bilinear upsample into
    # the 3x3 conv weights (all linear; per-channel upsample commutes).
    w3p = jnp.dot(w3.reshape(9 * Cin, Cout).astype(jnp.float32),
                  w1a.astype(jnp.float32), precision=hi)              # (9Cin, Cout)
    w3_blk = jnp.kron(jnp.eye(W, dtype=jnp.float32), w3p)             # (WK, W*Cout)
    a_w = _bilinear_matrix(W, Wo)
    k_w = jnp.asarray(np.kron(a_w.T, np.eye(Cout, dtype=np.float32))) # (W*Cout, WoC)
    w3k = jnp.dot(w3_blk, k_w, precision=hi).astype(cd)               # (WK, WoC)
    a_h = jnp.asarray(_bilinear_matrix(H, Ho)).astype(cd)             # (Ho, H)

    gamma_t = jnp.tile(jnp.asarray(gamma, jnp.float32).reshape(1, Cout), (1, Wo))
    beta_t = jnp.tile(jnp.asarray(beta, jnp.float32).reshape(1, Cout), (1, Wo))
    alpha1 = jnp.asarray(alpha, jnp.float32).reshape(-1)[:1]          # (1,) SMEM scalar

    # ---- grid / specs --------------------------------------------------------
    if multi_tile:
        grid = (B, n_t)
        dims = ("parallel", "arbitrary")   # conv scratch carried across t
        i_b = lambda b, t: (b, 0, 0)
        i_y = lambda b, t: (b, t, 0)
        i_w = lambda b, t: (0, 0)
        i_a = lambda b, t: (t, 0)
        ah_block = (tile_ho, H)
        scratch_shapes = [pltpu.VMEM((H, WoC), cd)]
    else:
        grid = (B,)
        dims = ("parallel",)
        i_b = lambda b: (b, 0, 0)
        i_y = lambda b: (b, 0, 0)
        i_w = lambda b: (0, 0)
        i_a = lambda b: (0, 0)
        ah_block = (Ho, H)
        scratch_shapes = []

    in_specs = [
        pl.BlockSpec((1, H, WK), i_b),                       # conv taps
        pl.BlockSpec((1, tile_ho, WoC), i_y),                # pre-mixed y tile
        pl.BlockSpec((WK, WoC), i_w),                        # folded conv weights
        pl.BlockSpec(ah_block, i_a),                         # A_h rows for tile
        pl.BlockSpec(memory_space=pltpu.MemorySpace.SMEM),   # PReLU alpha scalar
        pl.BlockSpec((1, WoC), i_w),                         # LN gamma
        pl.BlockSpec((1, WoC), i_w),                         # LN beta
    ]
    args = [taps, y_flat, w3k, a_h, alpha1, gamma_t, beta_t]
    if use_norm:
        p1 = jnp.asarray(np.kron(np.eye(Wo, dtype=np.float32),
                                 np.full((Cout, 1), 1.0 / Cout, np.float32))
                         ).astype(cd)                        # (WoC, Wo)
        p2 = jnp.asarray(np.kron(np.eye(Wo, dtype=np.float32),
                                 np.ones((1, Cout), np.float32))).astype(cd)  # (Wo, WoC)
        in_specs += [pl.BlockSpec((WoC, Wo), i_w), pl.BlockSpec((Wo, WoC), i_w)]
        args += [p1, p2]

    out = pl.pallas_call(
        _make_kernel(use_norm, eps, multi_tile),
        out_shape=jax.ShapeDtypeStruct((B, Ho, WoC), out_dtype),
        grid=grid,
        in_specs=in_specs,
        out_specs=pl.BlockSpec((1, tile_ho, WoC), i_y),
        scratch_shapes=scratch_shapes,
        compiler_params=pltpu.CompilerParams(
            dimension_semantics=dims, vmem_limit_bytes=vmem_limit),
    )(*args)

    out = out.reshape(B, Ho, Wo, Cout)
    if channels_last_out:
        return out                               # skip the extra HBM transpose pass
    return jnp.transpose(out, (0, 3, 1, 2))      # NCHW, faithful to the module


def norm_upsample_ref(x_nchw, y_nchw, params, *, scale=2, use_norm=False, eps=1e-6):
    """Pure-JAX f32 reference mirroring the PyTorch forward (bias=False convs)."""
    w3, w1a, w1b = params["w3"], params["w1a"], params["w1b"]
    alpha, gamma, beta = params["alpha"], params["gamma"], params["beta"]
    B, Cin, H, W = x_nchw.shape
    Cout = w3.shape[2]
    Ho, Wo = H * scale, W * scale

    x = jnp.transpose(x_nchw, (0, 2, 3, 1))
    y = jnp.transpose(y_nchw, (0, 2, 3, 1))
    w_hwio = w3.reshape(3, 3, Cin, Cout)
    conv = jax.lax.conv_general_dilated(
        x, w_hwio, window_strides=(1, 1), padding="SAME",
        dimension_numbers=("NHWC", "HWIO", "NHWC"))
    A_h = jnp.asarray(_bilinear_matrix(H, Ho))
    A_w = jnp.asarray(_bilinear_matrix(W, Wo))
    up = jnp.einsum("ih,bhwc->biwc", A_h, conv)
    up = jnp.einsum("jw,biwc->bijc", A_w, up)
    z = jnp.einsum("bijc,cd->bijd", up, w1a) + jnp.einsum("bijc,cd->bijd", y, w1b)
    z = jnp.where(z >= 0, z, alpha.reshape(()) * z)
    if use_norm:
        u = jnp.mean(z, axis=-1, keepdims=True)
        s = jnp.mean((z - u) ** 2, axis=-1, keepdims=True)
        z = (z - u) / jnp.sqrt(s + eps)
        z = z * gamma.reshape(1, 1, 1, Cout) + beta.reshape(1, 1, 1, Cout)
    return jnp.transpose(z, (0, 3, 1, 2))


def init_params(key, in_ch, out_ch):
    """Deterministic synthetic parameters (shapes follow NormUpsample.__init__)."""
    k1, k2 = jax.random.split(key)
    # Conv2d(in_ch, out_ch, 3, bias=False) weights, stored as (9, in_ch, out_ch)
    w3 = 0.1 * jax.random.normal(k1, (9, in_ch, out_ch), jnp.float32)
    # Conv2d(out_ch*2, out_ch, 1, bias=False), split into "upsampled-x"/"y" halves
    w1 = 0.1 * jax.random.normal(k2, (2 * out_ch, out_ch), jnp.float32)
    return dict(
        w3=w3,
        w1a=w1[:out_ch],
        w1b=w1[out_ch:],
        alpha=jnp.full((1, 1), 0.25, jnp.float32),      # nn.PReLU() default init
        gamma=jnp.ones((1, out_ch), jnp.float32),       # LayerNorm weight = ones
        beta=jnp.zeros((1, out_ch), jnp.float32),       # LayerNorm bias = zeros
    )


if __name__ == "__main__":
    B, in_ch, out_ch, H, W, scale = 2, 4, 8, 16, 16, 2
    key = jax.random.PRNGKey(0)
    kx, ky, kp = jax.random.split(key, 3)
    x = jax.random.normal(kx, (B, in_ch, H, W), jnp.float32)
    y = jax.random.normal(ky, (B, out_ch, H * scale, W * scale), jnp.float32)
    params = init_params(kp, in_ch, out_ch)

    for use_norm in (False, True):
        ref = norm_upsample_ref(x, y, params, scale=scale, use_norm=use_norm)

        # f32 operand path (tile_ho auto-selected -> full-height tile, grid=(B,)):
        # tight check against the f32 reference.
        out = norm_upsample(x, y, params, scale=scale, use_norm=use_norm,
                            compute_dtype=jnp.float32)
        out = jax.block_until_ready(out)
        assert out.shape == (B, out_ch, H * scale, W * scale)
        np.testing.assert_allclose(np.asarray(out), np.asarray(ref),
                                   rtol=2e-4, atol=2e-4)

        # bf16 MXU operand path (fast path on v6e/v7x, f32 accumulation),
        # compared against the f32 reference at bf16-level tolerance.
        out_bf = norm_upsample(x, y, params, scale=scale, use_norm=use_norm,
                               compute_dtype=jnp.bfloat16)
        out_bf = jax.block_until_ready(out_bf)
        np.testing.assert_allclose(np.asarray(out_bf), np.asarray(ref),
                                   rtol=1e-1, atol=1e-1)

    # Multi-row-tile fallback path (conv cached in VMEM scratch across tiles).
    ref = norm_upsample_ref(x, y, params, scale=scale, use_norm=True)
    out_mt = norm_upsample(x, y, params, scale=scale, use_norm=True,
                           compute_dtype=jnp.float32, tile_ho=16)
    out_mt = jax.block_until_ready(out_mt)
    np.testing.assert_allclose(np.asarray(out_mt), np.asarray(ref),
                               rtol=2e-4, atol=2e-4)

    print("KERNEL_OK")
</pallas_src>

<mosaic_0001>
module attributes {stable_mosaic.version = 11 : i64} {
  func.func @kernel(%arg0: i32, %arg1: memref<1x16x576xf32, #tpu.memory_space<vmem>>, %arg2: memref<1x32x256xf32, #tpu.memory_space<vmem>>, %arg3: memref<576x256xf32, #tpu.memory_space<vmem>>, %arg4: memref<32x16xf32, #tpu.memory_space<vmem>>, %arg5: memref<1xf32, #tpu.memory_space<smem>>, %arg6: memref<1x256xf32, #tpu.memory_space<vmem>>, %arg7: memref<1x256xf32, #tpu.memory_space<vmem>>, %arg8: memref<1x32x256xf32, #tpu.memory_space<vmem>>) attributes {dimension_semantics = [#tpu.dimension_semantics<parallel>], iteration_bounds = array<i64: 2>, scalar_prefetch = 0 : i64, scratch_operands = 0 : i64, tpu.core_type = #tpu.core_type<tc>, window_params = [{transform_indices = @transform_0, window_bounds = array<i64: 1, 16, 576>}, {transform_indices = @transform_1, window_bounds = array<i64: 1, 32, 256>}, {pipeline_mode = #tpu.pipeline_mode<synchronous>, transform_indices = @transform_2, window_bounds = array<i64: 576, 256>}, {pipeline_mode = #tpu.pipeline_mode<synchronous>, transform_indices = @transform_3, window_bounds = array<i64: 32, 16>}, {transform_indices = @transform_4, window_bounds = array<i64: 1>}, {pipeline_mode = #tpu.pipeline_mode<synchronous>, transform_indices = @transform_5, window_bounds = array<i64: 1, 256>}, {pipeline_mode = #tpu.pipeline_mode<synchronous>, transform_indices = @transform_6, window_bounds = array<i64: 1, 256>}, {transform_indices = @transform_7, window_bounds = array<i64: 1, 32, 256>}]} {
    %c0 = arith.constant 0 : index
    %c0_0 = arith.constant 0 : index
    %c0_1 = arith.constant 0 : index
    %0 = vector.load %arg1[%c0, %c0_0, %c0_1] : memref<1x16x576xf32, #tpu.memory_space<vmem>>, vector<1x16x576xf32>
    %1 = vector.shape_cast %0 : vector<1x16x576xf32> to vector<16x576xf32>
    %c0_2 = arith.constant 0 : index
    %c0_3 = arith.constant 0 : index
    %2 = vector.load %arg3[%c0_2, %c0_3] : memref<576x256xf32, #tpu.memory_space<vmem>>, vector<576x256xf32>
    %cst = arith.constant dense<0.000000e+00> : vector<16x256xf32>
    %3 = tpu.matmul %1, %2, %cst {dimension_numbers = #tpu.dot_dimension_numbers<[1], [0], [0], [1], [0, 0, 1, 1], [], []>} : vector<16x576xf32>, vector<576x256xf32>, vector<16x256xf32> -> vector<16x256xf32>
    %c0_4 = arith.constant 0 : index
    %c0_5 = arith.constant 0 : index
    %4 = vector.load %arg4[%c0_4, %c0_5] : memref<32x16xf32, #tpu.memory_space<vmem>>, vector<32x16xf32>
    %cst_6 = arith.constant dense<0.000000e+00> : vector<32x256xf32>
    %5 = tpu.matmul %4, %3, %cst_6 {dimension_numbers = #tpu.dot_dimension_numbers<[1], [0], [0], [1], [0, 0, 1, 1], [], []>} : vector<32x16xf32>, vector<16x256xf32>, vector<32x256xf32> -> vector<32x256xf32>
    %c0_7 = arith.constant 0 : index
    %c0_8 = arith.constant 0 : index
    %c0_9 = arith.constant 0 : index
    %6 = vector.load %arg2[%c0_7, %c0_8, %c0_9] : memref<1x32x256xf32, #tpu.memory_space<vmem>>, vector<1x32x256xf32>
    %7 = vector.shape_cast %6 : vector<1x32x256xf32> to vector<32x256xf32>
    %8 = arith.addf %5, %7 : vector<32x256xf32>
    %c0_10 = arith.constant 0 : index
    %9 = memref.load %arg5[%c0_10] : memref<1xf32, #tpu.memory_space<smem>>
    %cst_11 = arith.constant 0.000000e+00 : f32
    %10 = vector.broadcast %cst_11 : f32 to vector<32x256xf32>
    %11 = arith.cmpf oge, %8, %10 : vector<32x256xf32>
    %12 = vector.broadcast %9 : f32 to vector<32x256xf32>
    %13 = arith.mulf %12, %8 : vector<32x256xf32>
    %14 = arith.select %11, %8, %13 : vector<32x256xi1>, vector<32x256xf32>
    %c0_12 = arith.constant 0 : index
    %c0_13 = arith.constant 0 : index
    %c0_14 = arith.constant 0 : index
    %15 = vector.load %arg8[%c0_12, %c0_13, %c0_14] : memref<1x32x256xf32, #tpu.memory_space<vmem>>, vector<1x32x256xf32>
    %16 = vector.shape_cast %15 : vector<1x32x256xf32> to vector<32x256xf32>
    %17 = vector.shape_cast %14 : vector<32x256xf32> to vector<1x32x256xf32>
    tpu.vector_store %arg8[%c0_12, %c0_13, %c0_14], %17 {strides = array<i32>} : memref<1x32x256xf32, #tpu.memory_space<vmem>>, vector<1x32x256xf32>,
    return
  }
  func.func @transform_0(%arg0: i32) -> (i32, i32, i32) {
    %c0_i32 = arith.constant 0 : i32
    %c0_i32_0 = arith.constant 0 : i32
    %c0_i32_1 = arith.constant 0 : i32
    return %arg0, %c0_i32, %c0_i32_0 : i32, i32, i32
  }
  func.func @transform_1(%arg0: i32) -> (i32, i32, i32) {
    %c0_i32 = arith.constant 0 : i32
    %c0_i32_0 = arith.constant 0 : i32
    %c0_i32_1 = arith.constant 0 : i32
    return %arg0, %c0_i32, %c0_i32_0 : i32, i32, i32
  }
  func.func @transform_2(%arg0: i32) -> (i32, i32) {
    %c0_i32 = arith.constant 0 : i32
    %c0_i32_0 = arith.constant 0 : i32
    %c0_i32_1 = arith.constant 0 : i32
    return %c0_i32, %c0_i32_0 : i32, i32
  }
  func.func @transform_3(%arg0: i32) -> (i32, i32) {
    %c0_i32 = arith.constant 0 : i32
    %c0_i32_0 = arith.constant 0 : i32
    %c0_i32_1 = arith.constant 0 : i32
    return %c0_i32, %c0_i32_0 : i32, i32
  }
  func.func @transform_4(%arg0: i32) -> i32 {
    %c0_i32 = arith.constant 0 : i32
    %c0_i32_0 = arith.constant 0 : i32
    return %c0_i32 : i32
  }
  func.func @transform_5(%arg0: i32) -> (i32, i32) {
    %c0_i32 = arith.constant 0 : i32
    %c0_i32_0 = arith.constant 0 : i32
    %c0_i32_1 = arith.constant 0 : i32
    return %c0_i32, %c0_i32_0 : i32, i32
  }
  func.func @transform_6(%arg0: i32) -> (i32, i32) {
    %c0_i32 = arith.constant 0 : i32
    %c0_i32_0 = arith.constant 0 : i32
    %c0_i32_1 = arith.constant 0 : i32
    return %c0_i32, %c0_i32_0 : i32, i32
  }
  func.func @transform_7(%arg0: i32) -> (i32, i32, i32) {
    %c0_i32 = arith.constant 0 : i32
    %c0_i32_0 = arith.constant 0 : i32
    %c0_i32_1 = arith.constant 0 : i32
    return %arg0, %c0_i32, %c0_i32_0 : i32, i32, i32
  }
}

</mosaic_0001>

<bundles_post_ra>
// kernel: tpu_custom_call.1
= control target key start
LH: loop header
LB: loop body
LE: loop exit
PB: predicated region body
PF: predicated region fallthrough
CT: control target
= control target key end

     0   :  { %s1783_s0 = inlined_call_operand.hbm [shape: f32[2,16,576], index: 0, kind: input, shape index: {}]   ;;  %s1784_s1 = inlined_call_operand.hbm [shape: f32[2,32,256], index: 1, kind: input, shape index: {}]   ;;  %s1785_s2 = inlined_call_operand.hbm [shape: f32[576,256], index: 2, kind: input, shape index: {}]   ;;  %s1786_s3 = inlined_call_operand.vmem [shape: f32[32,16], index: 3, kind: input, shape index: {}]   ;;  %s1787_s4 = inlined_call_operand.<no memory space> [shape: f32[1], index: 4, kind: input, shape index: {}]   ;;  %s1788_s5 = inlined_call_operand.vmem [shape: f32[1,256], index: 5, kind: input, shape index: {}]   ;;  %s1789_s6 = inlined_call_operand.vmem [shape: f32[1,256], index: 6, kind: input, shape index: {}]   ;;  %s1790_s7 = inlined_call_operand.hbm [shape: f32[2,32,256], index: 7, kind: output, shape index: {}]  }
   0x1   :  { %1796 = sst [smem:[#allocation14_spill]] %s1783_s0 }
   0x2   :  { %1797 = sst [smem:[#allocation15_spill]] %s1785_s2 }
   0x3   :  { %12 = sst [smem:[#allocation2]] %s1787_s4 }
   0x4   :  { %13 = vsyncpa [#allocation4], 0 }
   0x5   :  { %15 = vsyncpa [#allocation4 + $0x1], 0 }
   0x6   :  { %16 = vsyncpa [#allocation7], 0 }
   0x7   :  { %18 = vsyncpa [#allocation7 + $0x1], 0 }
   0x8   :  { %19 = vsyncpa [#allocation5], 0 }
   0x9   :  { %21 = vsyncpa [#allocation5 + $0x1], 0  ;;  %s1482_s26 = smov 0   ;;  %s1484_s27 = smov 0  }
   0xa   :  { %s1486_s5 = smov 0   ;;  %s1488_s6 = smov 0  }
   0xb LB: > { %s1503_s4 = sadd.s32 4294967295, %s1426_s6   ;;  %s1011_s28 = sadd.s32 4294967294, %s1426_s6   ;;  %s1426_s6 = sphi %s1488_s6, %s1818_s6   ;;  %s1422_s5 = sphi %s1486_s5, %s1817_s5   ;;  %s1418_s27 = sphi %s1484_s27, %s1816_s27   ;;  %s1414_s26 = sphi %s1482_s26, %s1815_s26  }
   0xc   : > { %p47_p0 = scmp.ne.s32.totalorder %s1418_s27, %s1414_s26  ;;  %p1791_p1 = scmp.eq.s32.totalorder %s1503_s4, 0 }
   0xd   : > { %p208_p3 = scmp.eq.s32.totalorder %s1011_s28, 1  ;;  %p1012_p5 = scmp.ge.s32.totalorder %s1426_s6, 1 }
   0xe   : > { %p1512_p4 = por %p1791_p1, %p47_p0  ;;  %p215_p7 = scmp.lt.s32.totalorder %s1426_s6, 3 }
   0xf   : > { %p1517_p6 = por %p208_p3, %p47_p0  ;;  %s1428_s9 = smov [#allocation8]  }
  0x10   : > { %s1798_s29 = scalar_select %p1512_p4, 1, 0 }
  0x11   : > { %s1799_s30 = scalar_select %p1517_p6, 1, 0 }
  0x12   : > { %p1522_p8 = pnand %p1012_p5, %p215_p7  ;;  %s227_s10 = sshll.u32 %s1428_s9, 4  ;;  %s1526_s10 = int_to_ptr.vmem [resolvable:$true] %s227_s10 }
  0x13   : > { %s1538_s12 = sadd.s32 1, %s1426_s6   ;;  %s34_s13 = sadd.s32 1, %s1422_s5 }
  0x14   : > { %s1800_s8 = scalar_select %p1522_p8, 1, 0 }
  0x15   : > { %p1205_p9 = pneg %p1522_p8  ;;  %s31_s14 = ssub.s32 %s1426_s6, %s1538_s12 }
  0x16   : > { %s1802_s2 = sld [smem:[#allocation15_spill]] }
  0x17   : > { %p1533_p11 = pnand %p1205_p9, %p1791_p1 }
  0x19   : > { %p1266_p13 = pneg %p1533_p11 }
  0x1c   : > { %s1264_s17 = scalar_lea.hbm %s1802_s2, 18432 }
  0x1d   : > { %p1265_p12 = scmp.ne.s32.totalorder %s1802_s2, %s1264_s17  ;;  %p1271_p5 = scmp.lt.u32.totalorder %s1264_s17, %s1802_s2 }
  0x1f   : > { %p1267_p0 = pnand %p1266_p13, %p1265_p12 }
  0x21   : > { %p1268_p3 = pneg %p1267_p0 }
  0x23   : > { %p1273_p7 = pnand %p1271_p5, %p1268_p3 }
  0x25   : > { %1276 = shalt.err (!%p1273_p7)
}
  0x26   : > { %s1277_s22 = scalar_lea.vmem %s1526_s10, 18432  ;;  %p1285_p2 = scmp.lt.s32.totalorder %s1526_s10, %s1526_s10 }
  0x27   : > { %p1278_p9 = scmp.ne.s32.totalorder %s1526_s10, %s1277_s22  ;;  %p1286_p6 = scmp.lt.s32.totalorder %s1277_s22, %s1277_s22 }
  0x29   : > { %p1280_p10 = pnand %p1278_p9, %p1266_p13  ;;  %p1287_p4 = por %p1286_p6, %p1285_p2 }
  0x2b   : > { %p1281_p1 = pneg %p1280_p10 }
  0x2d   : > { %p1288_p8 = pnand %p1287_p4, %p1281_p1 }
  0x2f   : > { %1291 = shalt.err (!%p1288_p8)
}
  0x30   : > { %s1794_s23 = smov 256   ;;  %s1795_s24 = smov 16  }
  0x31   : > { %1208 = dma.hbm_to_vmem [thread:$0]  (!%p1533_p11), %s1802_s2, 18432, %s1526_s10, [#allocation7], %s1794_s23, %s1794_s23, %s1795_s24  }
  0x32   : > { %p32_p1 = scmp.eq.s32.totalorder %s31_s14, 0  ;;  %p41_p2 = scmp.ne.s32.totalorder %s1422_s5, %s1418_s27 }
  0x33   : > { %p42_p4 = scmp.eq.s32.totalorder %s1426_s6, 0  ;;  %p1221_p6 = scmp.lt.s32.totalorder %s1426_s6, 2 }
  0x34   : > { %s1572_s9 = scalar_select %p32_p1, %s1422_s5, %s34_s13  }
  0x35   : > { %p43_p8 = por %p42_p4, %p41_p2  ;;  %p1803_p10 = scmp.eq.s32.totalorder %s1503_s4, 1 }
  0x36   : > { %s1581_s11 = sand.u32 1, %s1422_s5   ;;  %s1193_s16 = smul.u32 1280, %s1426_s6 }
  0x37   : > { %p1576_p12 = por %p1803_p10, %p41_p2  ;;  %s1192_s17 = smul.u32 80, %s1581_s11 }
  0x38   : > { %s1805_s0 = sld [smem:[#allocation14_spill]]  ;;  %p1590_p11 = pnand %p1221_p6, %p43_p8 }
  0x39   : > { %s257_s19 = scalar_lea.vmem [#allocation3], %s1192_s17  ;;  %s254_s21 = scalar_lea.sflag [#allocation4], %s1581_s11 }
  0x3a   : > { %s264_s20 = sshll.u32 %s257_s19, 4  ;;  %p1294_p0 = pneg %p1590_p11  ;;  %s1594_s20 = int_to_ptr.vmem [resolvable:$true] %s264_s20 }
  0x3e   : > { %s1588_s14 = scalar_lea.hbm %s1805_s0, %s1193_s16  ;;  %s1297_s16 = scalar_lea.hbm %s1805_s0, 2560 }
  0x3f   : > { %s1292_s22 = scalar_lea.hbm %s1588_s14, 1280  ;;  %p1298_p7 = scmp.lt.u32.totalorder %s1588_s14, %s1805_s0 }
  0x40   : > { %p1293_p13 = scmp.ne.s32.totalorder %s1588_s14, %s1292_s22  ;;  %p1299_p9 = scmp.lt.u32.totalorder %s1297_s16, %s1292_s22 }
  0x41   : > { %p1301_p2 = scmp.lt.u32.totalorder %s1292_s22, %s1588_s14 }
  0x42   : > { %p1295_p3 = pnand %p1294_p0, %p1293_p13  ;;  %p1300_p1 = por %p1299_p9, %p1298_p7 }
  0x44   : > { %p1296_p5 = pneg %p1295_p3  ;;  %p1302_p4 = por %p1301_p2, %p1300_p1 }
  0x46   : > { %p1303_p6 = pnand %p1302_p4, %p1296_p5 }
  0x48   : > { %1306 = shalt.err (!%p1303_p6)
}
  0x49   : > { %s1307_s17 = scalar_lea.vmem %s1594_s20, 1280  ;;  %s1431_s19 = smov [#allocation3]  }
  0x4a   : > { %p1308_p8 = scmp.ne.s32.totalorder %s1594_s20, %s1307_s17  ;;  %s1312_s25 = sshll.u32 %s1431_s19, 4  ;;  %s1313_s25 = int_to_ptr.vmem [resolvable:$false] %s1312_s25 }
  0x4b   : > { %s1314_s28 = scalar_lea.vmem %s1313_s25, 2560  ;;  %p1315_p3 = scmp.lt.s32.totalorder %s1594_s20, %s1313_s25 }
  0x4c   : > { %p1310_p10 = pnand %p1308_p8, %p1294_p0  ;;  %p1316_p7 = scmp.lt.s32.totalorder %s1314_s28, %s1307_s17 }
  0x4e   : > { %p1311_p13 = pneg %p1310_p10  ;;  %p1317_p9 = por %p1316_p7, %p1315_p3 }
  0x50   : > { %p1318_p1 = pnand %p1317_p9, %p1311_p13 }
  0x52   : > { %1321 = shalt.err (!%p1318_p1)
}
  0x53   : > { %s1432_s22 = smov 640   ;;  %s1433_s16 = smov 40  }
  0x54   : > { %1212 = dma.hbm_to_vmem [thread:$0]  (!%p1590_p11), %s1588_s14, 1280, %s1594_s20, %s254_s21, %s1432_s22, %s1432_s22, %s1433_s16  }
  0x55   : > { %s274_s18 = sand.u32 1, %s1426_s6   ;;  %s1016_s10 = sshll.u32 %s1581_s11, 6 }
  0x56   : > { %s1034_s19 = sshll.u32 %s1426_s6, 10  ;;  %s278_s17 = scalar_lea.vmem [#allocation6], %s1016_s10 }
  0x57   : > { %s285_s25 = sshll.u32 %s278_s17, 4  ;;  %s1630_s24 = scalar_lea.hbm %s1784_s1, %s1034_s19  ;;  %s1632_s25 = int_to_ptr.vmem [resolvable:$true] %s285_s25 }
  0x58   : > { %s1634_s0 = scalar_lea.sflag [#allocation7], %s274_s18  ;;  %s1322_s2 = scalar_lea.hbm %s1630_s24, 1024 }
  0x59   : > { %p1323_p5 = scmp.ne.s32.totalorder %s1630_s24, %s1322_s2  ;;  %s1327_s23 = scalar_lea.hbm %s1784_s1, 2048 }
  0x5a   : > { %p1328_p6 = scmp.lt.u32.totalorder %s1630_s24, %s1784_s1  ;;  %p1329_p8 = scmp.lt.u32.totalorder %s1327_s23, %s1322_s2 }
  0x5b   : > { %p1325_p2 = pnand %p1323_p5, %p1294_p0  ;;  %p1331_p13 = scmp.lt.u32.totalorder %s1322_s2, %s1630_s24 }
  0x5c   : > { %p1330_p10 = por %p1329_p8, %p1328_p6 }
  0x5d   : > { %p1326_p4 = pneg %p1325_p2 }
  0x5e   : > { %p1332_p3 = por %p1331_p13, %p1330_p10 }
  0x60   : > { %p1333_p7 = pnand %p1332_p3, %p1326_p4 }
  0x62   : > { %1336 = shalt.err (!%p1333_p7)
}
  0x63   : > { %s1337_s22 = scalar_lea.vmem %s1632_s25, 1024  ;;  %s1434_s16 = smov [#allocation6]  }
  0x64   : > { %p1338_p9 = scmp.ne.s32.totalorder %s1632_s25, %s1337_s22  ;;  %s1342_s18 = sshll.u32 %s1434_s16, 4  ;;  %s1343_s18 = int_to_ptr.vmem [resolvable:$false] %s1342_s18 }
  0x65   : > { %s1344_s10 = scalar_lea.vmem %s1343_s18, 2048  ;;  %p1345_p2 = scmp.lt.s32.totalorder %s1632_s25, %s1343_s18 }
  0x66   : > { %p1340_p1 = pnand %p1338_p9, %p1294_p0  ;;  %p1346_p6 = scmp.lt.s32.totalorder %s1344_s10, %s1337_s22 }
  0x68   : > { %p1341_p5 = pneg %p1340_p1  ;;  %p1347_p8 = por %p1346_p6, %p1345_p2 }
  0x6a   : > { %p1348_p10 = pnand %p1347_p8, %p1341_p5 }
  0x6c   : > { %1351 = shalt.err (!%p1348_p10)
}
  0x6d   : > { %s1807_s2 = smov 16   ;;  %s1808_s19 = smov 256  }
  0x6e   : > { %1215 = dma.hbm_to_vmem [thread:$0]  (!%p1590_p11), %s1630_s24, 1024, %s1632_s25, %s1634_s0, %s1808_s19, %s1808_s19, %s1807_s2  }
  0x6f   : > { %p1809_p0 = scmp.ne.s32.totalorder %s1800_s8, 0 }
  0x70   : > { %s1666_s17 = sand.u32 (!%p1809_p0), 1, %s1418_s27   ;;  %p1810_p4 = scmp.ne.s32.totalorder (!%p1809_p0), %s1798_s29, 0 }
  0x71   : > { %297 = sbr.rel (%p1809_p0) target bundleno = 680 (0x2a8), region = 48  ;;  %s300_s11 = scalar_lea.sflag (!%p1809_p0), [#allocation4], %s1666_s17 }
  0x72   : > { %s1194_s28 = smul.u32 (!%p1809_p0), 80, %s1666_s17 }
  0x74   : > { %s1670_s14 = scalar_lea.vmem (!%p1809_p0), [#allocation3], %s1194_s28 }
  0x78   : > { %1397 = dma.done.wait (%p1810_p4), %s300_s11, 1280  }
  0x79   : > { %1399 = vsyncadd (%p1810_p4), %s300_s11, 4294966016  ;;  %s308_s0 = sand.u32 1, %s1503_s4   ;;  %s1020_s8 = sshll.u32 %s1666_s17, 6 }
  0x7a   : > { %s309_s24 = scalar_lea.sflag [#allocation7], %s308_s0  ;;  %s1680_s13 = scalar_lea.vmem [#allocation6], %s1020_s8 }
  0x7b   : > { %1401 = dma.done.wait (%p1810_p4), %s309_s24, 1024  }
  0x7c   : > { %1403 = vsyncadd (%p1810_p4), %s309_s24, 4294966272  ;;  %p1811_p11 = scmp.eq.s32.totalorder %s1503_s4, 0 }
  0x7e   : > { %1405 = dma.done.wait (%p1811_p11), [#allocation7], 18432   ;;  %p1812_p13 = pmov %p1811_p11 }
  0x7f   : > { %v427_v0 = vld [vmem:[#allocation8 + $0x208] sm:$0xff]  ;;  %v429_v1 = vld [vmem:[#allocation8 + $0x218] sm:$0xff]  ;;  %v426_v2 = vld [vmem:[#allocation8 + $0x200] sm:$0xff]  ;;  %vm506_vm0 = vcmask 523264   ;;  %vm756_vm1 = vcmask 130048   ;;  %s858_s10 = sld [smem:[#allocation2]] }
  0x80   : > { %1407 = vsyncadd (%p1812_p13), [#allocation7], 4294948864  ;;  %v1100_v3 = vpack.c.bf16 %v429_v1, %v427_v0  ;;  %v428_v4 = vld [vmem:[#allocation8 + $0x210] sm:$0xff]  ;;  %v431_v5 = vld [vmem:[#allocation8 + $0x228] sm:$0xff]  ;;  %s1718_s2 = scalar_lea.vmem [#allocation9], %s1020_s8  ;;  %s1035_s28 = sshll.u32 %s1503_s4, 10 }
  0x81   : > { %v433_v6 = vld [vmem:[#allocation8 + $0x238] sm:$0xff]  ;;  %v1102_v7 = vpack.c.bf16 %v428_v4, %v426_v2  ;;  %v430_v9 = vld [vmem:[#allocation8 + $0x220] sm:$0xff]  ;;  %v432_v10 = vld [vmem:[#allocation8 + $0x230] sm:$0xff]  ;;  %s906_s19 = sshll.u32 %s1718_s2, 4  ;;  %s1737_s0 = scalar_lea.hbm %s1790_s7, %s1035_s28  ;;  %s1731_s19 = int_to_ptr.vmem [resolvable:$true] %s906_s19 }
  0x82   : > { %v1104_v8 = vpack.c.bf16 %v433_v6, %v431_v5  ;;  %v435_v11 = vld [vmem:[#allocation8 + $0x248] sm:$0xff]  ;;  %1101 = vmatprep.subr.bf16.mxu0 %v1100_v3  ;;  %v437_v12 = vld [vmem:[#allocation8 + $0x258] sm:$0xff]  ;;  %v1106_v13 = vpack.c.bf16 %v432_v10, %v430_v9  ;;  %v434_v14 = vld [vmem:[#allocation8 + $0x240] sm:$0xff]  ;;  %s893_s4 = scalar_lea.sflag [#allocation5], %s1666_s17  ;;  %s1352_s8 = scalar_lea.vmem %s1731_s19, 1024 }
  0x83   : > { %1103 = vmatpush1.bf16.msra.mxu0 %v1102_v7  ;;  %v436_v15 = vld [vmem:[#allocation8 + $0x250] sm:$0xff]  ;;  %v1108_v16 = vpack.c.bf16 %v437_v12, %v435_v11  ;;  %v439_v17 = vld [vmem:[#allocation8 + $0x268] sm:$0xff]  ;;  %v365_v19 = vld [vmem:[#allocation8 + $0x18] sm:$0xff]  ;;  %p1353_p3 = scmp.ne.s32.totalorder %s1731_s19, %s1352_s8  ;;  %s1436_s24 = smov [#allocation9]  }
  0x84   : > { %1105 = vmatprep.subr.bf16.mxu0 %v1104_v8  ;;  %v363_v18 = vld [vmem:[#allocation8 + $0x8] sm:$0xff]  ;;  %v441_v20 = vld [vmem:[#allocation8 + $0x278] sm:$0xff]  ;;  %v362_v22 = vld [vmem:[#allocation8] sm:$0xff]  ;;  %v1110_v25 = vpack.c.bf16 %v436_v15, %v434_v14 }
  0x85   : > { %v1036_v21 = vpack.c.bf16 %v365_v19, %v363_v18  ;;  %v364_v23 = vld [vmem:[#allocation8 + $0x10] sm:$0xff]  ;;  %v367_v26 = vld [vmem:[#allocation8 + $0x28] sm:$0xff]  ;;  %v369_v27 = vld [vmem:[#allocation8 + $0x38] sm:$0xff]  ;;  %v1112_v29 = vpack.c.bf16 %v441_v20, %v439_v17  ;;  %p1354_p7 = pnand %p1353_p3, %p1576_p12 }
  0x86   : > { %v1038_v24 = vpack.c.bf16 %v364_v23, %v362_v22  ;;  %v366_v28 = vld [vmem:[#allocation8 + $0x20] sm:$0xff]  ;;  %v440_v31 = vld [vmem:[#allocation8 + $0x270] sm:$0xff]  ;;  %v1040_v32 = vpack.c.bf16 %v369_v27, %v367_v26  ;;  %v443_v34 = vld [vmem:[#allocation8 + $0x288] sm:$0xff] }
  0x87   : > { %1107 = vmatpush1.bf16.msra.mxu0 %v1106_v13  ;;  %1037 = vmatprep.subr.bf16.mxu1 %v1036_v21  ;;  %v438_v30 = vld [vmem:[#allocation8 + $0x260] sm:$0xff]  ;;  %v368_v33 = vld [vmem:[#allocation8 + $0x30] sm:$0xff]  ;;  %v445_v35 = vld [vmem:[#allocation8 + $0x298] sm:$0xff]  ;;  %p1355_p9 = pneg %p1354_p7 }
  0x88   : > { %1109 = vmatprep.subr.bf16.mxu0 %v1108_v16  ;;  %1039 = vmatpush1.bf16.msra.mxu1 %v1038_v24  ;;  %v1042_v36 = vpack.c.bf16 %v368_v33, %v366_v28  ;;  %v371_v37 = vld [vmem:[#allocation8 + $0x48] sm:$0xff]  ;;  %v373_v38 = vld [vmem:[#allocation8 + $0x58] sm:$0xff]  ;;  %v370_v39 = vld [vmem:[#allocation8 + $0x40] sm:$0xff]  ;;  %v1114_v41 = vpack.c.bf16 %v440_v31, %v438_v30  ;;  %v1116_v45 = vpack.c.bf16 %v445_v35, %v443_v34 }
  0x89   : > { %1041 = vmatprep.subr.bf16.mxu1 %v1040_v32  ;;  %v372_v40 = vld [vmem:[#allocation8 + $0x50] sm:$0xff]  ;;  %v442_v42 = vld [vmem:[#allocation8 + $0x280] sm:$0xff]  ;;  %v1044_v44 = vpack.c.bf16 %v373_v38, %v371_v37  ;;  %v447_v46 = vld [vmem:[#allocation8 + $0x2a8] sm:$0xff] }
  0x8a   : > { %v444_v43 = vld [vmem:[#allocation8 + $0x290] sm:$0xff]  ;;  %v1046_v47 = vpack.c.bf16 %v372_v40, %v370_v39  ;;  %v375_v48 = vld [vmem:[#allocation8 + $0x68] sm:$0xff]  ;;  %v377_v49 = vld [vmem:[#allocation8 + $0x78] sm:$0xff] }
  0x8b   : > { %1111 = vmatpush1.bf16.msra.mxu0 %v1110_v25  ;;  %v449_v50 = vld [vmem:[#allocation8 + $0x2b8] sm:$0xff]  ;;  %v1048_v51 = vpack.c.bf16 %v377_v49, %v375_v48  ;;  %v374_v52 = vld [vmem:[#allocation8 + $0x60] sm:$0xff]  ;;  %v376_v53 = vld [vmem:[#allocation8 + $0x70] sm:$0xff]  ;;  %v1118_v54 = vpack.c.bf16 %v444_v43, %v442_v42 }
  0x8c   : > { %1113 = vmatprep.subr.bf16.mxu0 %v1112_v29  ;;  %1043 = vmatpush1.bf16.msra.mxu1 %v1042_v36  ;;  %v379_v55 = vld [vmem:[#allocation8 + $0x88] sm:$0xff]  ;;  %v381_v56 = vld [vmem:[#allocation8 + $0x98] sm:$0xff]  ;;  %v1120_v57 = vpack.c.bf16 %v449_v50, %v447_v46  ;;  %v446_v58 = vld [vmem:[#allocation8 + $0x2a0] sm:$0xff]  ;;  %v1050_v61 = vpack.c.bf16 %v376_v53, %v374_v52 }
  0x8d   : > { %1045 = vmatprep.subr.bf16.mxu1 %v1044_v44  ;;  %v448_v59 = vld [vmem:[#allocation8 + $0x2b0] sm:$0xff]  ;;  %v451_v60 = vld [vmem:[#allocation8 + $0x2c8] sm:$0xff]  ;;  %v453_v62 = vld [vmem:[#allocation8 + $0x2d8] sm:$0xff]  ;;  %v1052_v63 = vpack.c.bf16 %v381_v56, %v379_v55 }
  0x8e   : > { %v378_v0 = vld [vmem:[#allocation8 + $0x80] sm:$0xff]  ;;  %v380_v1 = vld [vmem:[#allocation8 + $0x90] sm:$0xff]  ;;  %v383_v2 = vld [vmem:[#allocation8 + $0xa8] sm:$0xff]  ;;  %v1122_v4 = vpack.c.bf16 %v448_v59, %v446_v58  ;;  %v1124_v5 = vpack.c.bf16 %v453_v62, %v451_v60 }
  0x8f   : > { %1115 = vmatpush1.bf16.msra.mxu0 %v1114_v41  ;;  %v385_v3 = vld [vmem:[#allocation8 + $0xb8] sm:$0xff]  ;;  %v450_v6 = vld [vmem:[#allocation8 + $0x2c0] sm:$0xff]  ;;  %v452_v7 = vld [vmem:[#allocation8 + $0x2d0] sm:$0xff]  ;;  %v1054_v9 = vpack.c.bf16 %v380_v1, %v378_v0 }
  0x90   : > { %1117 = vmatprep.subr.bf16.mxu0 %v1116_v45  ;;  %1047 = vmatpush1.bf16.msra.mxu1 %v1046_v47  ;;  %v455_v8 = vld [vmem:[#allocation8 + $0x2e8] sm:$0xff]  ;;  %v457_v10 = vld [vmem:[#allocation8 + $0x2f8] sm:$0xff]  ;;  %v1056_v11 = vpack.c.bf16 %v385_v3, %v383_v2  ;;  %v382_v12 = vld [vmem:[#allocation8 + $0xa0] sm:$0xff]  ;;  %v1126_v16 = vpack.c.bf16 %v452_v7, %v450_v6 }
  0x91   : > { %1049 = vmatprep.subr.bf16.mxu1 %v1048_v51  ;;  %v384_v13 = vld [vmem:[#allocation8 + $0xb0] sm:$0xff]  ;;  %v387_v14 = vld [vmem:[#allocation8 + $0xc8] sm:$0xff]  ;;  %v389_v15 = vld [vmem:[#allocation8 + $0xd8] sm:$0xff]  ;;  %v1128_v17 = vpack.c.bf16 %v457_v10, %v455_v8 }
  0x92   : > { %v454_v18 = vld [vmem:[#allocation8 + $0x2e0] sm:$0xff]  ;;  %v456_v19 = vld [vmem:[#allocation8 + $0x2f0] sm:$0xff]  ;;  %v459_v20 = vld [vmem:[#allocation8 + $0x308] sm:$0xff]  ;;  %v1058_v21 = vpack.c.bf16 %v384_v13, %v382_v12  ;;  %v1060_v23 = vpack.c.bf16 %v389_v15, %v387_v14 }
  0x93   : > { %1119 = vmatpush1.bf16.msra.mxu0 %v1118_v54  ;;  %v461_v22 = vld [vmem:[#allocation8 + $0x318] sm:$0xff]  ;;  %v386_v24 = vld [vmem:[#allocation8 + $0xc0] sm:$0xff]  ;;  %v388_v25 = vld [vmem:[#allocation8 + $0xd0] sm:$0xff]  ;;  %v1130_v28 = vpack.c.bf16 %v456_v19, %v454_v18 }
  0x94   : > { %1121 = vmatprep.subr.bf16.mxu0 %v1120_v57  ;;  %1051 = vmatpush1.bf16.msra.mxu1 %v1050_v61  ;;  %v391_v26 = vld [vmem:[#allocation8 + $0xe8] sm:$0xff]  ;;  %v393_v27 = vld [vmem:[#allocation8 + $0xf8] sm:$0xff]  ;;  %v1132_v29 = vpack.c.bf16 %v461_v22, %v459_v20  ;;  %v458_v30 = vld [vmem:[#allocation8 + $0x300] sm:$0xff]  ;;  %v1062_v33 = vpack.c.bf16 %v388_v25, %v386_v24 }
  0x95   : > { %1053 = vmatprep.subr.bf16.mxu1 %v1052_v63  ;;  %v460_v31 = vld [vmem:[#allocation8 + $0x310] sm:$0xff]  ;;  %v463_v32 = vld [vmem:[#allocation8 + $0x328] sm:$0xff]  ;;  %v465_v34 = vld [vmem:[#allocation8 + $0x338] sm:$0xff]  ;;  %v1064_v35 = vpack.c.bf16 %v393_v27, %v391_v26 }
  0x96   : > { %v390_v36 = vld [vmem:[#allocation8 + $0xe0] sm:$0xff]  ;;  %v392_v37 = vld [vmem:[#allocation8 + $0xf0] sm:$0xff]  ;;  %v395_v38 = vld [vmem:[#allocation8 + $0x108] sm:$0xff]  ;;  %v1134_v40 = vpack.c.bf16 %v460_v31, %v458_v30  ;;  %v1136_v41 = vpack.c.bf16 %v465_v34, %v463_v32 }
  0x97   : > { %1123 = vmatpush1.bf16.msra.mxu0 %v1122_v4  ;;  %v397_v39 = vld [vmem:[#allocation8 + $0x118] sm:$0xff]  ;;  %v462_v42 = vld [vmem:[#allocation8 + $0x320] sm:$0xff]  ;;  %v464_v43 = vld [vmem:[#allocation8 + $0x330] sm:$0xff]  ;;  %v1066_v45 = vpack.c.bf16 %v392_v37, %v390_v36 }
  0x98   : > { %1125 = vmatprep.subr.bf16.mxu0 %v1124_v5  ;;  %1055 = vmatpush1.bf16.msra.mxu1 %v1054_v9  ;;  %v467_v44 = vld [vmem:[#allocation8 + $0x348] sm:$0xff]  ;;  %v469_v46 = vld [vmem:[#allocation8 + $0x358] sm:$0xff]  ;;  %v1068_v47 = vpack.c.bf16 %v397_v39, %v395_v38  ;;  %v394_v48 = vld [vmem:[#allocation8 + $0x100] sm:$0xff]  ;;  %v1138_v52 = vpack.c.bf16 %v464_v43, %v462_v42 }
  0x99   : > { %1057 = vmatprep.subr.bf16.mxu1 %v1056_v11  ;;  %v396_v49 = vld [vmem:[#allocation8 + $0x110] sm:$0xff]  ;;  %v399_v50 = vld [vmem:[#allocation8 + $0x128] sm:$0xff]  ;;  %v401_v51 = vld [vmem:[#allocation8 + $0x138] sm:$0xff]  ;;  %v1140_v54 = vpack.c.bf16 %v469_v46, %v467_v44 }
  0x9a   : > { %v466_v53 = vld [vmem:[#allocation8 + $0x340] sm:$0xff]  ;;  %v468_v55 = vld [vmem:[#allocation8 + $0x350] sm:$0xff]  ;;  %v471_v56 = vld [vmem:[#allocation8 + $0x368] sm:$0xff]  ;;  %v1070_v58 = vpack.c.bf16 %v396_v49, %v394_v48  ;;  %v1072_v59 = vpack.c.bf16 %v401_v51, %v399_v50 }
  0x9b   : > { %1127 = vmatpush1.bf16.msra.mxu0 %v1126_v16  ;;  %v473_v57 = vld [vmem:[#allocation8 + $0x378] sm:$0xff]  ;;  %v398_v60 = vld [vmem:[#allocation8 + $0x120] sm:$0xff]  ;;  %v400_v61 = vld [vmem:[#allocation8 + $0x130] sm:$0xff]  ;;  %v1142_v1 = vpack.c.bf16 %v468_v55, %v466_v53 }
  0x9c   : > { %1129 = vmatprep.subr.bf16.mxu0 %v1128_v17  ;;  %1059 = vmatpush1.bf16.msra.mxu1 %v1058_v21  ;;  %v355_v62 = vld [vmem:[%s1670_s14 + $0x18] sm:$0xff]  ;;  %v1144_v2 = vpack.c.bf16 %v473_v57, %v471_v56  ;;  %v470_v3 = vld [vmem:[#allocation8 + $0x360] sm:$0xff]  ;;  %v472_v4 = vld [vmem:[#allocation8 + $0x370] sm:$0xff]  ;;  %v1074_v6 = vpack.c.bf16 %v400_v61, %v398_v60 }
  0x9d   : > { %1061 = vmatprep.subr.bf16.mxu1 %v1060_v23  ;;  %v403_v63 = vld [vmem:[#allocation8 + $0x148] sm:$0xff]  ;;  %v405_v0 = vld [vmem:[#allocation8 + $0x158] sm:$0xff]  ;;  %654 = vmatprep.mubr.f32.mxu0 %v355_v62  ;;  %v402_v9 = vld [vmem:[#allocation8 + $0x140] sm:$0xff]  ;;  %v1146_v13 = vpack.c.bf16 %v472_v4, %v470_v3 }
  0x9e   : > { %v475_v5 = vld [vmem:[#allocation8 + $0x388] sm:$0xff]  ;;  %v477_v7 = vld [vmem:[#allocation8 + $0x398] sm:$0xff]  ;;  %v1076_v8 = vpack.c.bf16 %v405_v0, %v403_v63  ;;  %v404_v10 = vld [vmem:[#allocation8 + $0x150] sm:$0xff] }
  0x9f   : > { %1131 = vmatpush1.bf16.msra.mxu0 %v1130_v28  ;;  %v407_v11 = vld [vmem:[#allocation8 + $0x168] sm:$0xff]  ;;  %v409_v12 = vld [vmem:[#allocation8 + $0x178] sm:$0xff]  ;;  %v1148_v14 = vpack.c.bf16 %v477_v7, %v475_v5  ;;  %v474_v15 = vld [vmem:[#allocation8 + $0x380] sm:$0xff]  ;;  %v1078_v18 = vpack.c.bf16 %v404_v10, %v402_v9 }
  0xa0   : > { %1133 = vmatprep.subr.bf16.mxu0 %v1132_v29  ;;  %1063 = vmatpush1.bf16.msra.mxu1 %v1062_v33  ;;  %v476_v16 = vld [vmem:[#allocation8 + $0x390] sm:$0xff]  ;;  %v479_v17 = vld [vmem:[#allocation8 + $0x3a8] sm:$0xff]  ;;  %v481_v19 = vld [vmem:[#allocation8 + $0x3b8] sm:$0xff]  ;;  %v1080_v20 = vpack.c.bf16 %v409_v12, %v407_v11 }
  0xa1   : > { %1065 = vmatprep.subr.bf16.mxu1 %v1064_v35  ;;  %v406_v21 = vld [vmem:[#allocation8 + $0x160] sm:$0xff]  ;;  %v408_v22 = vld [vmem:[#allocation8 + $0x170] sm:$0xff]  ;;  %v411_v23 = vld [vmem:[#allocation8 + $0x188] sm:$0xff]  ;;  %v1150_v25 = vpack.c.bf16 %v476_v16, %v474_v15  ;;  %v1152_v27 = vpack.c.bf16 %v481_v19, %v479_v17 }
  0xa2   : > { %v413_v24 = vld [vmem:[#allocation8 + $0x198] sm:$0xff]  ;;  %v478_v26 = vld [vmem:[#allocation8 + $0x3a0] sm:$0xff]  ;;  %v480_v28 = vld [vmem:[#allocation8 + $0x3b0] sm:$0xff]  ;;  %v1082_v30 = vpack.c.bf16 %v408_v22, %v406_v21 }
  0xa3   : > { %1135 = vmatpush1.bf16.msra.mxu0 %v1134_v40  ;;  %v483_v29 = vld [vmem:[#allocation8 + $0x3c8] sm:$0xff]  ;;  %v485_v32 = vld [vmem:[#allocation8 + $0x3d8] sm:$0xff]  ;;  %v1084_v33 = vpack.c.bf16 %v413_v24, %v411_v23  ;;  %v410_v34 = vld [vmem:[#allocation8 + $0x180] sm:$0xff]  ;;  %v1154_v38 = vpack.c.bf16 %v480_v28, %v478_v26 }
  0xa4   : > { %1137 = vmatprep.subr.bf16.mxu0 %v1136_v41  ;;  %1067 = vmatpush1.bf16.msra.mxu1 %v1066_v45  ;;  %v353_v31 = vld [vmem:[%s1670_s14 + $0x8] sm:$0xff]  ;;  %v412_v35 = vld [vmem:[#allocation8 + $0x190] sm:$0xff]  ;;  %v1156_v39 = vpack.c.bf16 %v485_v32, %v483_v29  ;;  %v482_v40 = vld [vmem:[#allocation8 + $0x3c0] sm:$0xff] }
  0xa5   : > { %1069 = vmatprep.subr.bf16.mxu1 %v1068_v47  ;;  %577 = vmatprep.mubr.f32.mxu1 %v353_v31  ;;  %v415_v36 = vld [vmem:[#allocation8 + $0x1a8] sm:$0xff]  ;;  %v417_v37 = vld [vmem:[#allocation8 + $0x1b8] sm:$0xff]  ;;  %v484_v41 = vld [vmem:[#allocation8 + $0x3d0] sm:$0xff]  ;;  %v1086_v43 = vpack.c.bf16 %v412_v35, %v410_v34 }
  0xa6   : > { %v487_v42 = vld [vmem:[#allocation8 + $0x3e8] sm:$0xff]  ;;  %v489_v44 = vld [vmem:[#allocation8 + $0x3f8] sm:$0xff]  ;;  %v1088_v45 = vpack.c.bf16 %v417_v37, %v415_v36  ;;  %v414_v46 = vld [vmem:[#allocation8 + $0x1a0] sm:$0xff]  ;;  %v1158_v50 = vpack.c.bf16 %v484_v41, %v482_v40 }
  0xa7   : > { %1139 = vmatpush1.bf16.msra.mxu0 %v1138_v52  ;;  %v416_v47 = vld [vmem:[#allocation8 + $0x1b0] sm:$0xff]  ;;  %v419_v48 = vld [vmem:[#allocation8 + $0x1c8] sm:$0xff]  ;;  %v421_v49 = vld [vmem:[#allocation8 + $0x1d8] sm:$0xff]  ;;  %v1160_v51 = vpack.c.bf16 %v489_v44, %v487_v42 }
  0xa8   : > { %1141 = vmatprep.subr.bf16.mxu0 %v1140_v54  ;;  %1071 = vmatpush1.bf16.msra.mxu1 %v1070_v58  ;;  %v486_v52 = vld [vmem:[#allocation8 + $0x3e0] sm:$0xff]  ;;  %v488_v53 = vld [vmem:[#allocation8 + $0x3f0] sm:$0xff]  ;;  %v491_v54 = vld [vmem:[#allocation8 + $0x408] sm:$0xff]  ;;  %v1090_v55 = vpack.c.bf16 %v416_v47, %v414_v46  ;;  %v1092_v57 = vpack.c.bf16 %v421_v49, %v419_v48 }
  0xa9   : > { %1073 = vmatprep.subr.bf16.mxu1 %v1072_v59  ;;  %v493_v56 = vld [vmem:[#allocation8 + $0x418] sm:$0xff]  ;;  %v418_v58 = vld [vmem:[#allocation8 + $0x1c0] sm:$0xff]  ;;  %v420_v59 = vld [vmem:[#allocation8 + $0x1d0] sm:$0xff]  ;;  %v1162_v62 = vpack.c.bf16 %v488_v53, %v486_v52 }
  0xaa   : > { %v423_v60 = vld [vmem:[#allocation8 + $0x1e8] sm:$0xff]  ;;  %v425_v61 = vld [vmem:[#allocation8 + $0x1f8] sm:$0xff]  ;;  %v1164_v63 = vpack.c.bf16 %v493_v56, %v491_v54  ;;  %v490_v0 = vld [vmem:[#allocation8 + $0x400] sm:$0xff]  ;;  %v1094_v3 = vpack.c.bf16 %v420_v59, %v418_v58  ;;  %v867_v56 = vstv %s858_s10 }
  0xab   : > { %1143 = vmatpush1.bf16.msra.mxu0 %v1142_v1  ;;  %v492_v1 = vld [vmem:[#allocation8 + $0x410] sm:$0xff]  ;;  %v497_v4 = vld [vmem:[#allocation8 + $0x438] sm:$0xff]  ;;  %v1096_v5 = vpack.c.bf16 %v425_v61, %v423_v60  ;;  %v494_v11 = vld [vmem:[#allocation8 + $0x420] sm:$0xff] }
  0xac   : > { %1145 = vmatprep.subr.bf16.mxu0 %v1144_v2  ;;  %1075 = vmatpush1.bf16.msra.mxu1 %v1074_v6  ;;  %v495_v2 = vld [vmem:[#allocation8 + $0x428] sm:$0xff]  ;;  %v422_v6 = vld [vmem:[#allocation8 + $0x1e0] sm:$0xff]  ;;  %v424_v7 = vld [vmem:[#allocation8 + $0x1f0] sm:$0xff]  ;;  %v1166_v9 = vpack.c.bf16 %v492_v1, %v490_v0 }
  0xad   : > { %1077 = vmatprep.subr.bf16.mxu1 %v1076_v8  ;;  %v354_v8 = vld [vmem:[%s1670_s14 + $0x10] sm:$0xff]  ;;  %v1168_v10 = vpack.c.bf16 %v497_v4, %v495_v2  ;;  %v499_v15 = vld [vmem:[#allocation8 + $0x448] sm:$0xff]  ;;  %v501_v16 = vld [vmem:[#allocation8 + $0x458] sm:$0xff] }
  0xae   : > { %v496_v12 = vld [vmem:[#allocation8 + $0x430] sm:$0xff]  ;;  %v1172_v19 = vpack.c.bf16 %v501_v16, %v499_v15  ;;  %v503_v23 = vld [vmem:[#allocation8 + $0x468] sm:$0xff]  ;;  %v505_v24 = vld [vmem:[#allocation8 + $0x478] sm:$0xff] }
  0xaf   : > { %1147 = vmatpush1.bf16.msra.mxu0 %v1146_v13  ;;  %v360_v13 = vld [vmem:[%s1670_s14 + $0x40] sm:$0xff]  ;;  %v1170_v17 = vpack.c.bf16 %v496_v12, %v494_v11  ;;  %v357_v31 = vld [vmem:[%s1670_s14 + $0x28] sm:$0xff] }
  0xb0   : > { %1149 = vmatprep.subr.bf16.mxu0 %v1148_v14  ;;  %1079 = vmatpush1.bf16.msra.mxu1 %v1078_v18  ;;  %v1098_v14 = vpack.c.bf16 %v424_v7, %v422_v6  ;;  %v359_v18 = vld [vmem:[%s1670_s14 + $0x38] sm:$0xff]  ;;  %v500_v21 = vld [vmem:[#allocation8 + $0x450] sm:$0xff]  ;;  %v502_v28 = vld [vmem:[#allocation8 + $0x460] sm:$0xff] }
  0xb1   : > { %1081 = vmatprep.subr.bf16.mxu1 %v1080_v20  ;;  %v498_v20 = vld [vmem:[#allocation8 + $0x440] sm:$0xff]  ;;  %v504_v29 = vld [vmem:[#allocation8 + $0x470] sm:$0xff]  ;;  %v361_v34 = vld [vmem:[%s1670_s14 + $0x48] sm:$0xff] }
  0xb2   : > { %v352_v22 = vld [vmem:[%s1670_s14] sm:$0xff]  ;;  %v1174_v26 = vpack.c.bf16 %v500_v21, %v498_v20  ;;  %v1178_v32 = vpack.c.bf16 %v504_v29, %v502_v28  ;;  %v747_v52 = vld [vmem:[%s1786_s3 + $0x18] sm:$0xff]  ;;  %v749_v54 = vld [vmem:[%s1680_s13 + $0x8] sm:$0xff] }
  0xb3   : > { %1151 = vmatpush1.bf16.msra.mxu0 %v1150_v25  ;;  %v358_v25 = vld [vmem:[%s1670_s14 + $0x30] sm:$0xff] }
  0xb4   : > { %1153 = vmatprep.subr.bf16.mxu0 %v1152_v27  ;;  %1083 = vmatpush1.bf16.msra.mxu1 %v1082_v30  ;;  %v1176_v27 = vpack.c.bf16 %v505_v24, %v503_v23  ;;  %v1435_v30 = vmov 0.0   ;;  %v744_v49 = vld [vmem:[%s1786_s3] sm:$0xff]  ;;  %v750_v60 = vld [vmem:[%s1680_s13 + $0x10] sm:$0xff] }
  0xb5   : > { %1085 = vmatprep.subr.bf16.mxu1 %v1084_v33  ;;  %v356_v33 = vld [vmem:[%s1670_s14 + $0x20] sm:$0xff] }
  0xb6   : > { %v748_v53 = vld [vmem:[%s1680_s13] sm:$0xff]  ;;  %v754_v16 = vld [vmem:[%s1680_s13 + $0x30] sm:$0xff] }
  0xb7   : > { %1155 = vmatpush1.bf16.msra.mxu0 %v1154_v38  ;;  %v752_v6 = vld [vmem:[%s1680_s13 + $0x20] sm:$0xff] }
  0xb8   : > { %1157 = vmatprep.subr.bf16.mxu0 %v1156_v39  ;;  %1087 = vmatpush1.bf16.msra.mxu1 %v1086_v43 }
  0xb9   : > { %1089 = vmatprep.subr.bf16.mxu1 %v1088_v45 }
  0xbb   : > { %1159 = vmatpush1.bf16.msra.mxu0 %v1158_v50  ;;  %v745_v50 = vld [vmem:[%s1786_s3 + $0x8] sm:$0xff] }
  0xbc   : > { %1161 = vmatprep.subr.bf16.mxu0 %v1160_v51  ;;  %1091 = vmatpush1.bf16.msra.mxu1 %v1090_v55  ;;  %v746_v51 = vld [vmem:[%s1786_s3 + $0x10] sm:$0xff] }
  0xbd   : > { %1093 = vmatprep.subr.bf16.mxu1 %v1092_v57 }
  0xbf   : > { %1163 = vmatpush1.bf16.msra.mxu0 %v1162_v62  ;;  %v751_v62 = vld [vmem:[%s1680_s13 + $0x18] sm:$0xff] }
  0xc0   : > { %1165 = vmatprep.subr.bf16.mxu0 %v1164_v63  ;;  %1095 = vmatpush1.bf16.msra.mxu1 %v1094_v3 }
  0xc1   : > { %1097 = vmatprep.subr.bf16.mxu1 %v1096_v5 }
  0xc2   : > { %655 = vmatmul.mubr.f32.vlgmr.msra.gmra.mrb[0].mxu0 %v354_v8  ;;  %v753_v8 = vld [vmem:[%s1680_s13 + $0x28] sm:$0xff] }
  0xc3   : > { %1167 = vmatpush1.bf16.msra.mxu0 %v1166_v9  ;;  %660 = vmatprep.mubr.f32.mxu0 %v360_v13 }
  0xc4   : > { %1169 = vmatprep.subr.bf16.mxu0 %v1168_v10  ;;  %1099 = vmatpush1.bf16.msra.mxu1 %v1098_v14 }
  0xc6   : > { %661 = vmatmul.mubr.f32.gmra.mrb[2].mxu0 %v359_v18  ;;  %v755_v18 = vld [vmem:[%s1680_s13 + $0x38] sm:$0xff]  ;;  %s1356_s13 = sshll.u32 %s1436_s24, 4  ;;  %s1357_s13 = int_to_ptr.vmem [resolvable:$false] %s1356_s13 }
  0xc7   : > { %1171 = vmatpush1.bf16.msra.mxu0 %v1170_v17  ;;  %578 = vmatmul.mubr.f32.vlgmr.msra.gmra.mrb[0].mxu1 %v352_v22  ;;  %s1358_s29 = scalar_lea.vmem %s1357_s13, 2048  ;;  %p1359_p1 = scmp.lt.s32.totalorder %s1731_s19, %s1357_s13 }
  0xc8   : > { %1173 = vmatprep.subr.bf16.mxu0 %v1172_v19  ;;  %731 = vmatprep.mubr.f32.mxu0 %v1435_v30  ;;  %p1360_p5 = scmp.lt.s32.totalorder %s1358_s29, %s1352_s8 }
  0xc9   : > { %583 = vmatprep.mubr.f32.mxu1 %v358_v25 }
  0xca   : > { %p1361_p2 = por %p1360_p5, %p1359_p1 }
  0xcb   : > { %1175 = vmatpush1.bf16.msra.mxu0 %v1174_v26  ;;  %584 = vmatmul.mubr.f32.gmra.mrb[2].mxu1 %v357_v31 }
  0xcc   : > { %1177 = vmatprep.subr.bf16.mxu0 %v1176_v27  ;;  %833 = vmatprep.mubr.f32.mxu1 %v1435_v30  ;;  %p1362_p6 = pnand %p1361_p2, %p1355_p9 }
  0xcf   : > { %1179 = vmatpush1.bf16.msra.mxu0 %v1178_v32 }
  0xd2   : > { %1023 = vmatmul.mubr.msk.f32.vlgmr.msra.gmra.mrb[0].mxu0 %vm506_vm0, %v356_v33 }
  0xd3   : > { %737 = vmatprep.mubr.f32.mxu0 %v1435_v30 }
  0xd6   : > { %1024 = vmatmul.mubr.msk.f32.gmra.mrb[2].mxu0 %vm506_vm0, %v361_v34 }
 0x19a   : > { %v579_v35 = vpop.f32.mrb[0].mxu1 }
 0x19b   : > { %v581_v36 = vpop.f32.mrb[1].mxu1 }
 0x19e   : > { %v585_v37 = vpop.f32.mrb[2].mxu1 }
 0x19f   : > { %v587_v38 = vpop.f32.mrb[3].mxu1 }
 0x1a5   : > { %v733_v39 = vpop.f32.mrb[0].mxu0 }
 0x1a6   : > { %v1184_v40 = vadd.f32 %v733_v39, %v579_v35  ;;  %v735_v41 = vpop.f32.mrb[1].mxu0 }
 0x1a7   : > { %v1185_v42 = vadd.f32 %v735_v41, %v581_v36 }
 0x1a9   : > { %v739_v43 = vpop.f32.mrb[2].mxu0 }
 0x1aa   : > { %v1186_v44 = vadd.f32 %v739_v43, %v585_v37  ;;  %v741_v45 = vpop.f32.mrb[3].mxu0 }
 0x1ab   : > { %v1187_v46 = vadd.f32 %v741_v45, %v587_v38 }
 0x1ac   : > { %v1182_v47 = vpack.c.bf16 %v1186_v44, %v1184_v40 }
 0x1ad   : > { %v1180_v48 = vpack.c.bf16 %v1187_v46, %v1185_v42 }
 0x1af   : > { %1181 = vmatprep.subr.bf16.mxu1 %v1180_v48 }
 0x1b0   : > { %1183 = vmatpush1.bf16.msra.mxu1 %v1182_v47 }
 0x1b3   : > { %1025 = vmatmul.mubr.msk.f32.vlgmr.msra.gmra.mrb[4].mxu1 %vm756_vm1, %v744_v49 }
 0x1b4   : > { %839 = vmatprep.mubr.f32.mxu1 %v1435_v30 }
 0x1b7   : > { %1026 = vmatmul.mubr.msk.f32.gmra.mrb[6].mxu1 %vm756_vm1, %v745_v50 }
 0x1b8   : > { %845 = vmatprep.mubr.f32.mxu1 %v1435_v30 }
 0x1bb   : > { %1027 = vmatmul.mubr.msk.f32.gmra.mrb[8].mxu1 %vm756_vm1, %v746_v51 }
 0x1bc   : > { %851 = vmatprep.mubr.f32.mxu1 %v1435_v30 }
 0x1bf   : > { %1028 = vmatmul.mubr.msk.f32.gmra.mrb[10].mxu1 %vm756_vm1, %v747_v52 }
 0x286   : > { %v835_v55 = vpop.f32.mrb[4].mxu1 }
 0x287   : > { %v836_v57 = vadd.f32 %v835_v55, %v748_v53  ;;  %v837_v58 = vpop.f32.mrb[5].mxu1 }
 0x288   : > { %v838_v59 = vadd.f32 %v837_v58, %v749_v54 }
 0x289   : > { %vm859_vm2 = vcmp.ge.f32.partialorder %v836_v57, 0.0  ;;  %v868_v61 = vmul.f32 %v867_v56, %v836_v57 }
 0x28a   : > { %vm860_vm3 = vcmp.ge.f32.partialorder %v838_v59, 0.0  ;;  %v869_v63 = vmul.f32 %v867_v56, %v838_v59  ;;  %v841_v0 = vpop.f32.mrb[6].mxu1 }
 0x28b   : > { %v876_v1 = vsel %vm859_vm2, %v836_v57, %v868_v61  ;;  %v842_v2 = vadd.f32 %v841_v0, %v750_v60  ;;  %v843_v3 = vpop.f32.mrb[7].mxu1 }
 0x28c   : > { %884 = vst [vmem:[%s1718_s2] sm:$0xff] %v876_v1  ;;  %v877_v4 = vsel %vm860_vm3, %v838_v59, %v869_v63  ;;  %v844_v5 = vadd.f32 %v843_v3, %v751_v62 }
 0x28d   : > { %885 = vst [vmem:[%s1718_s2 + $0x8] sm:$0xff] %v877_v4  ;;  %vm861_vm4 = vcmp.ge.f32.partialorder %v842_v2, 0.0  ;;  %v870_v7 = vmul.f32 %v867_v56, %v842_v2 }
 0x28e   : > { %vm862_vm5 = vcmp.ge.f32.partialorder %v844_v5, 0.0  ;;  %v871_v9 = vmul.f32 %v867_v56, %v844_v5  ;;  %v847_v10 = vpop.f32.mrb[8].mxu1 }
 0x28f   : > { %v878_v11 = vsel %vm861_vm4, %v842_v2, %v870_v7  ;;  %v848_v12 = vadd.f32 %v847_v10, %v752_v6  ;;  %v849_v13 = vpop.f32.mrb[9].mxu1 }
 0x290   : > { %886 = vst [vmem:[%s1718_s2 + $0x10] sm:$0xff] %v878_v11  ;;  %v879_v14 = vsel %vm862_vm5, %v844_v5, %v871_v9  ;;  %v850_v15 = vadd.f32 %v849_v13, %v753_v8 }
 0x291   : > { %887 = vst [vmem:[%s1718_s2 + $0x18] sm:$0xff] %v879_v14  ;;  %vm863_vm6 = vcmp.ge.f32.partialorder %v848_v12, 0.0  ;;  %v872_v17 = vmul.f32 %v867_v56, %v848_v12 }
 0x292   : > { %vm864_vm7 = vcmp.ge.f32.partialorder %v850_v15, 0.0  ;;  %v873_v19 = vmul.f32 %v867_v56, %v850_v15  ;;  %v853_v20 = vpop.f32.mrb[10].mxu1 }
 0x293   : > { %v880_v21 = vsel %vm863_vm6, %v848_v12, %v872_v17  ;;  %v854_v22 = vadd.f32 %v853_v20, %v754_v16  ;;  %v855_v23 = vpop.f32.mrb[11].mxu1 }
 0x294   : > { %888 = vst [vmem:[%s1718_s2 + $0x20] sm:$0xff] %v880_v21  ;;  %v881_v24 = vsel %vm864_vm7, %v850_v15, %v873_v19  ;;  %v856_v25 = vadd.f32 %v855_v23, %v755_v18 }
 0x295   : > { %889 = vst [vmem:[%s1718_s2 + $0x28] sm:$0xff] %v881_v24  ;;  %vm865_vm8 = vcmp.ge.f32.partialorder %v854_v22, 0.0  ;;  %v874_v26 = vmul.f32 %v867_v56, %v854_v22 }
 0x296   : > { %vm866_vm9 = vcmp.ge.f32.partialorder %v856_v25, 0.0  ;;  %v875_v27 = vmul.f32 %v867_v56, %v856_v25 }
 0x297   : > { %v882_v28 = vsel %vm865_vm8, %v854_v22, %v874_v26 }
 0x298   : > { %890 = vst [vmem:[%s1718_s2 + $0x30] sm:$0xff] %v882_v28  ;;  %v883_v29 = vsel %vm866_vm9, %v856_v25, %v875_v27 }
 0x299   : > { %891 = vst [vmem:[%s1718_s2 + $0x38] sm:$0xff] %v883_v29 }
 0x29a   : > { %1365 = shalt.err (!%p1362_p6)
}
 0x29b   : > { %s1366_s25 = scalar_lea.hbm %s1737_s0, 1024  ;;  %s1370_s21 = scalar_lea.hbm %s1790_s7, 2048 }
 0x29c   : > { %p1367_p8 = scmp.ne.s32.totalorder %s1737_s0, %s1366_s25  ;;  %p1371_p4 = scmp.lt.u32.totalorder %s1737_s0, %s1790_s7 }
 0x29d   : > { %p1372_p11 = scmp.lt.u32.totalorder %s1370_s21, %s1366_s25  ;;  %p1374_p3 = scmp.lt.u32.totalorder %s1366_s25, %s1737_s0 }
 0x29e   : > { %p1368_p10 = pnand %p1367_p8, %p1576_p12 }
 0x29f   : > { %p1373_p13 = por %p1372_p11, %p1371_p4 }
 0x2a0   : > { %p1369_p0 = pneg %p1368_p10 }
 0x2a1   : > { %p1375_p7 = por %p1374_p3, %p1373_p13 }
 0x2a3   : > { %p1376_p9 = pnand %p1375_p7, %p1369_p0 }
 0x2a5   : > { %1379 = shalt.err (!%p1376_p9)
}
 0x2a6   : > { %s1437_s18 = smov 256   ;;  %s1438_s10 = smov 16  }
 0x2a7   : > { %1203 = dma.vmem_to_hbm [thread:$0]  (%p1576_p12), %s1731_s19, 1024, %s1737_s0, %s893_s4, %s1437_s18, %s1437_s18, %s1438_s10  }
 0x2a8 PF: > { %s921_s2 = sand.u32 1, %s1414_s26   ;;  %p1813_p1 = scmp.ne.s32.totalorder %s1799_s30, 0 }
 0x2a9   : > { %p1814_p5 = scmp.ge.s32.totalorder %s1426_s6, 2  ;;  %s922_s28 = scalar_lea.sflag [#allocation5], %s921_s2 }
 0x2ab   : > { %p1217_p2 = pnand %p1814_p5, %p1813_p1 }
 0x2ad   : > { %1409 = dma.done.wait (!%p1217_p2), %s922_s28, 1024  }
 0x2ae   : > { %1411 = vsyncadd (!%p1217_p2), %s922_s28, 4294966272  ;;  %p24_p6 = scmp.ge.s32.totalorder %s1538_s12, 4   ;;  %s1815_s26 = smov %s1418_s27 }
 0x2af   : > { %s1816_s27 = smov %s1422_s5  ;;  %s1817_s5 = smov %s1572_s9 }
 0x2b0   : > { %s1818_s6 = smov %s1538_s12  ;;  %26 = sbr.rel (!%p24_p6) target bundleno = 11 (0xb), region = 110 }
 0x2b7   :  { %927 = vsyncpa [#allocation4], 1 }
 0x2b8   :  { %929 = vsyncpa [#allocation4 + $0x1], 1 }
 0x2b9   :  { %930 = vsyncpa [#allocation7], 1 }
 0x2ba   :  { %932 = vsyncpa [#allocation7 + $0x1], 1 }
 0x2bb   :  { %933 = vsyncpa [#allocation5], 1 }
 0x2bc   :  { %935 = vsyncpa [#allocation5 + $0x1], 1 }

</bundles_post_ra>
